<compile_context>
chip_gen: v7x
topology: tpu7x:2x2x1
jax: 0.10.0
libtpu: 0.0.40
codegen_flags: <defaults>
</compile_context>

<pallas_src>
import math

import jax
import jax.numpy as jnp
from jax.experimental import pallas as pl
from jax.experimental.pallas import tpu as pltpu


# bf16 MXU operands on all generations (v5e/v6e/v7x); accumulation stays float32.
COMPUTE_DTYPE = jnp.bfloat16
# Scoped-VMEM budget: <=32 MiB is safe on v7x (64 MiB physical); raise to ~64-96 MiB
# on v5e/v6e (128 MiB physical) together with larger tile caps.
_VMEM_LIMIT = 32 * 1024 * 1024


def _choose_tile(dim, cap, align):
    """Largest tile <= cap that is a multiple of `align` and divides `dim`,
    falling back to the full dimension (full-dim blocks are always legal)."""
    if dim <= cap:
        return dim
    t = (min(cap, dim) // align) * align
    while t >= align:
        if dim % t == 0:
            return t
        t -= align
    return dim


# ---------------------------------------------------------------------------
# Tiled matmul:  (M, K) @ (K, N) -> (M, N), f32 accumulation directly in o_ref.
# ---------------------------------------------------------------------------
def _matmul_kernel(x_ref, w_ref, o_ref):
    @pl.when(pl.program_id(2) == 0)
    def _():
        o_ref[...] = jnp.zeros_like(o_ref)

    o_ref[...] += jnp.dot(x_ref[...].astype(COMPUTE_DTYPE),
                          w_ref[...].astype(COMPUTE_DTYPE),
                          preferred_element_type=jnp.float32)


def matmul(x, w, *, tm_cap=256, tn_cap=512, tk_cap=512):
    """x: (M, K) f32, w: (K, N) f32 -> (M, N) f32 (bf16 MXU operands, f32 acc)."""
    M, K = x.shape
    N = w.shape[1]
    tm = _choose_tile(M, tm_cap, 8)
    tn = _choose_tile(N, tn_cap, 128)
    tk = _choose_tile(K, tk_cap, 128)
    grid = (M // tm, N // tn, K // tk)
    return pl.pallas_call(
        _matmul_kernel,
        out_shape=jax.ShapeDtypeStruct((M, N), jnp.float32),
        grid_spec=pltpu.PrefetchScalarGridSpec(
            num_scalar_prefetch=0,
            grid=grid,
            in_specs=[pl.BlockSpec((tm, tk), lambda i, j, k: (i, k)),
                      pl.BlockSpec((tk, tn), lambda i, j, k: (k, j))],
            out_specs=pl.BlockSpec((tm, tn), lambda i, j, k: (i, j))),
        compiler_params=pltpu.CompilerParams(
            dimension_semantics=("parallel", "parallel", "arbitrary"),
            vmem_limit_bytes=_VMEM_LIMIT),
    )(x, w)


# ---------------------------------------------------------------------------
# Head-major flash attention with masked softmax.
#   grid = (B*H, Tq tiles, Tk tiles); online softmax over the Tk axis;
#   accumulator lives in o_ref (block index invariant over the KV axis).
# ---------------------------------------------------------------------------
def _flash_attn_kernel(vl_ref, q_ref, k_ref, v_ref, o_ref, m_ref, l_ref):
    bh = pl.program_id(0)
    ki = pl.program_id(2)
    nk = pl.num_programs(2)
    blk_k = k_ref.shape[1]

    @pl.when(ki == 0)
    def _():
        m_ref[...] = jnp.full_like(m_ref, -jnp.inf)
        l_ref[...] = jnp.zeros_like(l_ref)
        o_ref[...] = jnp.zeros_like(o_ref)

    vl = vl_ref[bh]
    kv_start = ki * blk_k

    # Skip tiles that lie entirely beyond valid_len (their softmax weight
    # underflows to exactly 0 in f32).  vl == 0 keeps processing so the
    # reference's "all masked -> uniform attention" behavior is preserved.
    @pl.when(jnp.logical_or(vl == 0, kv_start < vl))
    def _():
        q = q_ref[0].astype(COMPUTE_DTYPE)     # 1/sqrt(Dh) already folded into Wq
        k = k_ref[0].astype(COMPUTE_DTYPE)
        v = v_ref[0].astype(COMPUTE_DTYPE)

        # Contract the head dim of q with the head dim of k (no materialized k.T).
        s = jax.lax.dot_general(q, k, (((1,), (1,)), ((), ())),
                                preferred_element_type=jnp.float32)

        # Mask bias built once per KV step from a (1, blk_k) iota; broadcast add.
        kv_pos = kv_start + jax.lax.broadcasted_iota(jnp.int32, (1, blk_k), 1)
        s = s + jnp.where(kv_pos < vl, 0.0, -1000000.0)

        m_prev = m_ref[...]
        m_new = jnp.maximum(m_prev, jnp.max(s, axis=-1, keepdims=True))
        alpha = jnp.exp(m_prev - m_new)
        p = jnp.exp(s - m_new)

        l_ref[...] = alpha * l_ref[...] + jnp.sum(p, axis=-1, keepdims=True)
        m_ref[...] = m_new

        pv = jnp.dot(p.astype(COMPUTE_DTYPE), v, preferred_element_type=jnp.float32)
        # Lane-dense full-width accumulator update, directly into the output block.
        o_ref[0] = alpha * o_ref[0] + pv

    @pl.when(ki == nk - 1)
    def _():
        l = l_ref[...]
        inv = pl.reciprocal(l, approx=True)     # EUP slot instead of VALU divide
        inv = inv * (2.0 - l * inv)             # one Newton step -> full f32 accuracy
        o_ref[0] = o_ref[0] * inv


def flash_attention(q, k, v, valid_lens, *, tq_cap=256, tk_cap=256):
    """q: (B*H, Tq, Dh), k/v: (B*H, Tk, Dh), valid_lens: (B*H,) int32.
    Returns (B*H, Tq, Dh) float32."""
    BH, Tq, Dh = q.shape
    Tk = k.shape[1]
    blk_q = _choose_tile(Tq, tq_cap, 8)
    kalign = 128 if Tk % 128 == 0 else 8        # 128-aligned KV tiles when possible
    blk_k = _choose_tile(Tk, tk_cap, kalign)
    n_q = Tq // blk_q
    n_k = Tk // blk_k

    def q_index(bh, qi, ki, vl_ref):
        return (bh, qi, 0)

    def kv_index(bh, qi, ki, vl_ref):
        vl = vl_ref[bh]
        # Last tile that still contains a valid key position (for vl > 0).
        last_valid = jnp.maximum((vl + blk_k - 1) // blk_k - 1, 0)
        # Clamp fully-masked tiles to the last valid tile: the block is already
        # resident so no new DMA is issued (the kernel skips their compute).
        # vl == 0 keeps the natural index (uniform-attention fallback needs all tiles).
        return (bh, jnp.where(vl == 0, ki, jnp.minimum(ki, last_valid)), 0)

    grid_spec = pltpu.PrefetchScalarGridSpec(
        num_scalar_prefetch=1,
        grid=(BH, n_q, n_k),
        in_specs=[pl.BlockSpec((1, blk_q, Dh), q_index),
                  pl.BlockSpec((1, blk_k, Dh), kv_index),
                  pl.BlockSpec((1, blk_k, Dh), kv_index)],
        out_specs=pl.BlockSpec((1, blk_q, Dh), q_index),
        scratch_shapes=[pltpu.VMEM((blk_q, 1), jnp.float32),   # m (running max)
                        pltpu.VMEM((blk_q, 1), jnp.float32)])  # l (running sum)
    return pl.pallas_call(
        _flash_attn_kernel,
        out_shape=jax.ShapeDtypeStruct((BH, Tq, Dh), jnp.float32),
        grid_spec=grid_spec,
        compiler_params=pltpu.CompilerParams(
            dimension_semantics=("parallel", "parallel", "arbitrary"),
            vmem_limit_bytes=_VMEM_LIMIT),
    )(valid_lens, q, k, v)


# ---------------------------------------------------------------------------
# MultiHeadAttention wrapper (glue in plain JAX, hot path in Pallas)
# ---------------------------------------------------------------------------
class MultiHeadAttentionPallas:
    def __init__(self, key_size, query_size, value_size, num_hiddens,
                 num_heads, dropout=0.0, bias=False, *, rng_key):
        assert not bias, "bias=False, matching the reference default"
        assert num_hiddens % num_heads == 0
        self.num_heads = num_heads
        self.num_hiddens = num_hiddens
        self.head_dim = num_hiddens // num_heads
        k1, k2, k3, k4 = jax.random.split(rng_key, 4)

        def init(k, fan_in, fan_out):
            # deterministic init matching nn.Linear's U(-1/sqrt(fan_in), 1/sqrt(fan_in))
            bound = 1.0 / math.sqrt(fan_in)
            return jax.random.uniform(k, (fan_in, fan_out), jnp.float32,
                                      -bound, bound)

        # stored as (in, out) so the kernels compute x @ W directly
        self.Wq = init(k1, query_size, num_hiddens)
        self.Wk = init(k2, key_size, num_hiddens)
        self.Wv = init(k3, value_size, num_hiddens)
        self.Wo = init(k4, num_hiddens, num_hiddens)

        # Fold 1/sqrt(Dh) into the query projection weight (free at runtime).
        scale = 1.0 / math.sqrt(self.head_dim)
        self.Wq_scaled = self.Wq * scale
        # Concatenated QKV weight: one wide matmul for the self-attention case.
        if query_size == key_size == value_size:
            self.W_qkv = jnp.concatenate([self.Wq_scaled, self.Wk, self.Wv], axis=1)
        else:
            self.W_qkv = None

    def _to_head_major(self, x, B, T):
        H, Dh = self.num_heads, self.head_dim
        x = x.reshape(B, T, H, Dh)
        x = jnp.transpose(x, (0, 2, 1, 3))
        return x.reshape(B * H, T, Dh)

    def __call__(self, queries, keys, values, valid_lens, *,
                 tq_cap=256, tk_cap=256):
        B, Tq, _ = queries.shape
        Tk = keys.shape[1]
        NH, H, Dh = self.num_hiddens, self.num_heads, self.head_dim

        if (queries is keys) and (keys is values) and self.W_qkv is not None:
            # Fused QKV projection: one matmul with a 3x wider N (no activation stack).
            qkv = matmul(queries.reshape(B * Tq, -1), self.W_qkv)      # (B*Tq, 3*NH)
            q_p = qkv[:, :NH]
            k_p = qkv[:, NH:2 * NH]
            v_p = qkv[:, 2 * NH:]
        else:
            q_p = matmul(queries.reshape(B * Tq, -1), self.Wq_scaled)
            k_p = matmul(keys.reshape(B * Tk, -1), self.Wk)
            v_p = matmul(values.reshape(B * Tk, -1), self.Wv)

        # Head-major (B*H, T, Dh) layout: full-width, lane-dense blocks per head.
        q_hm = self._to_head_major(q_p.reshape(B, Tq, NH), B, Tq)
        k_hm = self._to_head_major(k_p.reshape(B, Tk, NH), B, Tk)
        v_hm = self._to_head_major(v_p.reshape(B, Tk, NH), B, Tk)

        if valid_lens is None:
            vl = jnp.full((B * H,), Tk, dtype=jnp.int32)          # every key valid
        else:
            if valid_lens.ndim != 1:
                # TODO(synk): 2-D (batch, num_queries) valid_lens not supported yet.
                raise NotImplementedError("2-D valid_lens not supported")
            # Same semantics as torch.repeat_interleave(valid_lens, num_heads, dim=0).
            vl = jnp.repeat(valid_lens.astype(jnp.int32), H)

        attn = flash_attention(q_hm, k_hm, v_hm, vl,
                               tq_cap=tq_cap, tk_cap=tk_cap)       # (B*H, Tq, Dh)

        # transpose_output: (B*H, Tq, Dh) -> (B, Tq, NH), then the output projection.
        out = attn.reshape(B, H, Tq, Dh)
        out = jnp.transpose(out, (0, 2, 1, 3)).reshape(B * Tq, NH)
        return matmul(out, self.Wo).reshape(B, Tq, NH)


# ---------------------------------------------------------------------------
# Pure-JAX float32 reference for verification (mirrors the PyTorch module)
# ---------------------------------------------------------------------------
def reference_forward(mha, queries, keys, values, valid_lens):
    H = mha.num_heads

    def transpose_qkv(X):
        B, T, NH = X.shape
        X = X.reshape(B, T, H, -1)
        X = jnp.transpose(X, (0, 2, 1, 3))
        return X.reshape(B * H, T, -1)

    q = transpose_qkv(queries @ mha.Wq)
    k = transpose_qkv(keys @ mha.Wk)
    v = transpose_qkv(values @ mha.Wv)
    d = q.shape[-1]
    scores = jnp.einsum('bqd,bkd->bqk', q, k) / math.sqrt(d)
    if valid_lens is not None:
        vl = jnp.repeat(valid_lens, H, axis=0)
        mask = jnp.arange(k.shape[1])[None, None, :] < vl[:, None, None]
        scores = jnp.where(mask, scores, -1000000.0)
    attn = jax.nn.softmax(scores, axis=-1)
    out = jnp.einsum('bqk,bkd->bqd', attn, v)
    B = queries.shape[0]
    out = out.reshape(B, H, out.shape[1], -1)
    out = jnp.transpose(out, (0, 2, 1, 3))
    out = out.reshape(B, out.shape[1], -1)
    return out @ mha.Wo


if __name__ == "__main__":
    # small, module-consistent shapes
    batch = 2
    seq_q = 8
    seq_kv = 16
    query_size = key_size = value_size = 16
    num_hiddens = 32
    num_heads = 4

    root = jax.random.PRNGKey(0)
    kx, kq, kk, kv, kp = jax.random.split(root, 5)

    mha = MultiHeadAttentionPallas(key_size, query_size, value_size,
                                   num_hiddens, num_heads, dropout=0.0,
                                   bias=False, rng_key=kp)

    # bf16 MXU operands across the three matmul stages give ~1e-3..1e-2 abs error
    # vs the pure-f32 reference at these shapes; tolerance chosen accordingly.
    TOL = dict(atol=4e-2, rtol=4e-2)

    # --- Test 1: self-attention (fused QKV path), 1-D valid_lens ---------------
    x = jax.random.normal(kx, (batch, seq_q, query_size), jnp.float32)
    vlen1 = jnp.array([3, 6], dtype=jnp.int32)
    out1 = jax.block_until_ready(mha(x, x, x, vlen1))
    ref1 = reference_forward(mha, x, x, x, vlen1)
    assert out1.shape == (batch, seq_q, num_hiddens)
    assert jnp.allclose(out1, ref1, **TOL), "mismatch vs reference (self-attn)"

    # --- Test 2: cross-attention, multiple KV tiles + masked-tile skip ---------
    queries = jax.random.normal(kq, (batch, seq_q, query_size), jnp.float32)
    keys = jax.random.normal(kk, (batch, seq_kv, key_size), jnp.float32)
    values = jax.random.normal(kv, (batch, seq_kv, value_size), jnp.float32)
    vlen2 = jnp.array([5, 12], dtype=jnp.int32)
    out2 = jax.block_until_ready(mha(queries, keys, values, vlen2, tk_cap=8))
    ref2 = reference_forward(mha, queries, keys, values, vlen2)
    assert out2.shape == (batch, seq_q, num_hiddens)
    assert jnp.allclose(out2, ref2, **TOL), "mismatch vs reference (cross-attn)"

    # --- Test 3: no mask (valid_lens=None) -------------------------------------
    out3 = jax.block_until_ready(mha(x, x, x, None))
    ref3 = reference_forward(mha, x, x, x, None)
    assert jnp.allclose(out3, ref3, **TOL), "mismatch vs reference (no mask)"

    print("KERNEL_OK")
</pallas_src>

<mosaic_0001>
module attributes {stable_mosaic.version = 11 : i64} {
  func.func @_matmul_kernel(%arg0: i32, %arg1: i32, %arg2: i32, %arg3: memref<16x16xf32, #tpu.memory_space<vmem>>, %arg4: memref<16x96xf32, #tpu.memory_space<vmem>>, %arg5: memref<16x96xf32, #tpu.memory_space<vmem>>) attributes {dimension_semantics = [#tpu.dimension_semantics<parallel>, #tpu.dimension_semantics<parallel>, #tpu.dimension_semantics<arbitrary>], iteration_bounds = array<i64: 1, 1, 1>, scalar_prefetch = 0 : i64, scratch_operands = 0 : i64, tpu.core_type = #tpu.core_type<tc>, window_params = [{transform_indices = @transform_0, window_bounds = array<i64: 16, 16>}, {transform_indices = @transform_1, window_bounds = array<i64: 16, 96>}, {transform_indices = @transform_2, window_bounds = array<i64: 16, 96>}]} {
    %c0_i32 = arith.constant 0 : i32
    %0 = arith.cmpi eq, %arg2, %c0_i32 : i32
    %1 = arith.extui %0 : i1 to i32
    %c0_i32_0 = arith.constant 0 : i32
    %2 = arith.cmpi ne, %1, %c0_i32_0 : i32
    scf.if %2 {
      %cst_8 = arith.constant 0.000000e+00 : f32
      %11 = vector.broadcast %cst_8 : f32 to vector<16x96xf32>
      %c0_9 = arith.constant 0 : index
      %c0_10 = arith.constant 0 : index
      %12 = vector.load %arg5[%c0_9, %c0_10] : memref<16x96xf32, #tpu.memory_space<vmem>>, vector<16x96xf32>
      tpu.vector_store %arg5[%c0_9, %c0_10], %11 {strides = array<i32>} : memref<16x96xf32, #tpu.memory_space<vmem>>, vector<16x96xf32>,
    } else {
    }
    %c0 = arith.constant 0 : index
    %c0_1 = arith.constant 0 : index
    %3 = vector.load %arg5[%c0, %c0_1] : memref<16x96xf32, #tpu.memory_space<vmem>>, vector<16x96xf32>
    %c0_2 = arith.constant 0 : index
    %c0_3 = arith.constant 0 : index
    %4 = vector.load %arg3[%c0_2, %c0_3] : memref<16x16xf32, #tpu.memory_space<vmem>>, vector<16x16xf32>
    %5 = arith.truncf %4 : vector<16x16xf32> to vector<16x16xbf16>
    %c0_4 = arith.constant 0 : index
    %c0_5 = arith.constant 0 : index
    %6 = vector.load %arg4[%c0_4, %c0_5] : memref<16x96xf32, #tpu.memory_space<vmem>>, vector<16x96xf32>
    %7 = arith.truncf %6 : vector<16x96xf32> to vector<16x96xbf16>
    %cst = arith.constant dense<0.000000e+00> : vector<16x96xf32>
    %8 = tpu.matmul %5, %7, %cst {dimension_numbers = #tpu.dot_dimension_numbers<[1], [0], [0], [1], [0, 0, 1, 1], [], []>} : vector<16x16xbf16>, vector<16x96xbf16>, vector<16x96xf32> -> vector<16x96xf32>
    %9 = arith.addf %3, %8 : vector<16x96xf32>
    %c0_6 = arith.constant 0 : index
    %c0_7 = arith.constant 0 : index
    %10 = vector.load %arg5[%c0_6, %c0_7] : memref<16x96xf32, #tpu.memory_space<vmem>>, vector<16x96xf32>
    tpu.vector_store %arg5[%c0_6, %c0_7], %9 {strides = array<i32>} : memref<16x96xf32, #tpu.memory_space<vmem>>, vector<16x96xf32>,
    return
  }
  func.func @transform_0(%arg0: i32, %arg1: i32, %arg2: i32) -> (i32, i32) {
    %c0_i32 = arith.constant 0 : i32
    return %arg0, %arg2 : i32, i32
  }
  func.func @transform_1(%arg0: i32, %arg1: i32, %arg2: i32) -> (i32, i32) {
    %c0_i32 = arith.constant 0 : i32
    return %arg2, %arg1 : i32, i32
  }
  func.func @transform_2(%arg0: i32, %arg1: i32, %arg2: i32) -> (i32, i32) {
    %c0_i32 = arith.constant 0 : i32
    return %arg0, %arg1 : i32, i32
  }
}

</mosaic_0001>

<bundles_post_ra>
// kernel: tpu_custom_call.1
= control target key start
LH: loop header
LB: loop body
LE: loop exit
PB: predicated region body
PF: predicated region fallthrough
CT: control target
= control target key end

     0   :  { %7 = vsyncpa [#allocation3], 0  ;;  %s283_s0 = inlined_call_operand.hbm [shape: f32[16,16], index: 0, kind: input, shape index: {}]   ;;  %s284_s1 = inlined_call_operand.hbm [shape: f32[16,96], index: 1, kind: input, shape index: {}]   ;;  %s285_s2 = inlined_call_operand.hbm [shape: f32[16,96], index: 2, kind: output, shape index: {}]  }
   0x1   :  { %8 = vsyncpa [#allocation6], 0 }
   0x2   :  { %9 = vsyncpa [#allocation4], 0  ;;  %s212_s9 = smov [#allocation2]   ;;  %s140_s13 = scalar_lea.hbm %s283_s0, 256 }
   0x3   :  { %s15_s10 = sshll.u32 %s212_s9, 4  ;;  %p141_p0 = scmp.ne.s32.totalorder %s283_s0, %s140_s13  ;;  %s16_s10 = int_to_ptr.vmem [resolvable:$true] %s15_s10 }
   0x4   :  { %p144_p1 = scmp.lt.u32.totalorder %s140_s13, %s283_s0 }
   0x6   :  { %p146_p2 = pnand %p144_p1, %p141_p0 }
   0x8   :  { %149 = shalt.err (!%p146_p2)
}
   0x9   :  { %s150_s18 = scalar_lea.vmem %s16_s10, 256  ;;  %p155_p4 = scmp.lt.s32.totalorder %s16_s10, %s16_s10 }
   0xa   :  { %p151_p3 = scmp.ne.s32.totalorder %s16_s10, %s150_s18  ;;  %p156_p5 = scmp.lt.s32.totalorder %s150_s18, %s150_s18 }
   0xc   :  { %p157_p6 = por %p156_p5, %p155_p4 }
   0xe   :  { %p158_p7 = pnand %p157_p6, %p151_p3 }
  0x10   :  { %161 = shalt.err (!%p158_p7)
}
  0x11   :  { %s213_s19 = smov 128   ;;  %s214_s20 = smov 8  }
  0x12   :  { %21 = dma.hbm_to_vmem [thread:$0]  %s283_s0, 256, %s16_s10, [#allocation3], %s213_s19, %s213_s19, %s214_s20  }
  0x13   :  { %s215_s23 = smov [#allocation5]   ;;  %s162_s27 = scalar_lea.hbm %s284_s1, 256 }
  0x14   :  { %s27_s24 = sshll.u32 %s215_s23, 4  ;;  %p163_p8 = scmp.ne.s32.totalorder %s284_s1, %s162_s27  ;;  %s28_s24 = int_to_ptr.vmem [resolvable:$true] %s27_s24 }
  0x15   :  { %p166_p9 = scmp.lt.u32.totalorder %s162_s27, %s284_s1 }
  0x17   :  { %p168_p10 = pnand %p166_p9, %p163_p8 }
  0x19   :  { %171 = shalt.err (!%p168_p10)
}
  0x1a   :  { %s172_s4 = scalar_lea.vmem %s28_s24, 256  ;;  %p177_p12 = scmp.lt.s32.totalorder %s28_s24, %s28_s24 }
  0x1b   :  { %p173_p11 = scmp.ne.s32.totalorder %s28_s24, %s172_s4  ;;  %p178_p13 = scmp.lt.s32.totalorder %s172_s4, %s172_s4 }
  0x1d   :  { %p179_p0 = por %p178_p13, %p177_p12 }
  0x1f   :  { %p180_p1 = pnand %p179_p0, %p173_p11 }
  0x21   :  { %183 = shalt.err (!%p180_p1)
}
  0x22   :  { %33 = dma.hbm_to_vmem [thread:$0]  %s284_s1, 256, %s28_s24, [#allocation6], %s213_s19, %s213_s19, %s214_s20  }
  0x23   :  { %206 = dma.done.wait [#allocation3], 256  }
  0x24   :  { %207 = vsyncadd [#allocation3], 4294967040 }
  0x25   :  { %208 = dma.done.wait [#allocation6], 256  }
  0x26   :  { %209 = vsyncadd [#allocation6], 4294967040  ;;  %vm45_vm0 = vcmask 785408   ;;  %v216_v0 = vmov 0.0   ;;  %vm217_vm1 = vmmov 0   ;;  %v53_v1 = vld [vmem:[#allocation5] sm:$0xff] }
  0x27   :  { %46 = vst.msk [vmem:[#allocation7] sm:$0xff] %vm45_vm0, %v216_v0  ;;  %47 = vst.msk [vmem:[#allocation7 + $0x8] sm:$0xff] %vm45_vm0, %v216_v0  ;;  %127 = vmatprep.subr.bf16.mxu0 %v216_v0  ;;  %129 = vmatprep.mubr.msk.bf16.mxu0 %vm217_vm1, %v216_v0  ;;  %v54_v2 = vld [vmem:[#allocation5 + $0x8] sm:$0xff]  ;;  %v50_v3 = vld [vmem:[#allocation2] sm:$0xff]  ;;  %vm56_vm2 = vcmask 130048   ;;  %s218_s1 = smov [#allocation7]  }
  0x28   :  { %v55_v4 = vpack.c.bf16 %v54_v2, %v53_v1  ;;  %v51_v5 = vld [vmem:[#allocation2 + $0x8] sm:$0xff]  ;;  %s111_s6 = sshll.u32 %s218_s1, 4  ;;  %s112_s6 = int_to_ptr.vmem [resolvable:$true] %s111_s6 }
  0x29   :  { %v52_v6 = vpack.c.bf16 %v51_v5, %v50_v3  ;;  %s184_s7 = scalar_lea.vmem %s112_s6, 256  ;;  %p189_p3 = scmp.lt.s32.totalorder %s112_s6, %s112_s6 }
  0x2a   :  { %128 = vmatpush3.bf16.msra.mxu0 %v55_v4  ;;  %p185_p2 = scmp.ne.s32.totalorder %s112_s6, %s184_s7  ;;  %p190_p4 = scmp.lt.s32.totalorder %s184_s7, %s184_s7 }
  0x2c   :  { %p191_p5 = por %p190_p4, %p189_p3 }
  0x2d   :  { %130 = vmatmul.mubr.msk.bf16.vlgmr.msra.gmra.mrb[0].mxu0 %vm56_vm2, %v52_v6 }
  0x2e   :  { %v48_v7 = vld [vmem:[#allocation7] sm:$0xff]  ;;  %v49_v9 = vld [vmem:[#allocation7 + $0x8] sm:$0xff]  ;;  %p192_p6 = pnand %p191_p5, %p185_p2 }
 0x100   :  { %v94_v8 = vpop.f32.mrb[0].mxu0 }
 0x101   :  { %v101_v10 = vadd.f32 %v94_v8, %v48_v7  ;;  %v131_v11 = vpop.f32.mrb[1].mxu0 }
 0x102   :  { %v97_v12 = vpop.f32.mrb[2].mxu0 }
 0x103   :  { %104 = vst.msk [vmem:[#allocation7] sm:$0xff] %vm45_vm0, %v101_v10  ;;  %v102_v13 = vadd.f32 %v97_v12, %v49_v9  ;;  %v132_v14 = vpop.f32.mrb[3].mxu0 }
 0x105   :  { %105 = vst.msk [vmem:[#allocation7 + $0x8] sm:$0xff] %vm45_vm0, %v102_v13 }
 0x106   :  { %195 = shalt.err (!%p192_p6)
}
 0x107   :  { %s196_s10 = scalar_lea.hbm %s285_s2, 256 }
 0x108   :  { %p197_p7 = scmp.ne.s32.totalorder %s285_s2, %s196_s10  ;;  %p200_p8 = scmp.lt.u32.totalorder %s196_s10, %s285_s2 }
 0x10a   :  { %p202_p9 = pnand %p200_p8, %p197_p7 }
 0x10c   :  { %205 = shalt.err (!%p202_p9)
}
 0x10d   :  { %117 = dma.vmem_to_hbm [thread:$0]  %s112_s6, 256, %s285_s2, [#allocation4], %s213_s19, %s213_s19, %s214_s20  }
 0x10e   :  { %210 = dma.done.wait [#allocation4], 256  }
 0x10f   :  { %211 = vsyncadd [#allocation4], 4294967040 }
 0x110   :  { %121 = vsyncpa [#allocation3], 1 }
 0x111   :  { %122 = vsyncpa [#allocation6], 1 }
 0x112   :  { %123 = vsyncpa [#allocation4], 1 }

</bundles_post_ra>
